<compile_context>
chip_gen: v6e
topology: v6e:2x2x1
jax: 0.10.0
libtpu: 0.0.40
codegen_flags: <defaults>
</compile_context>

<pallas_src>
import functools
import math

import jax
import jax.numpy as jnp
from jax.experimental import pallas as pl
from jax.experimental.pallas import tpu as pltpu


def _round_up(n, m):
    return ((n + m - 1) // m) * m


def _num_tensorcores():
    """Best-effort TensorCore count of the default device (1 on v5e/v6e)."""
    try:
        d = jax.devices()[0]
        nc = int(getattr(d, "num_cores", 0) or 0)
        if nc > 1:
            return nc
        kind = str(getattr(d, "device_kind", "")).lower()
        if "v7" in kind:
            return 2
    except Exception:
        pass
    return 1


def _gat_kernel(x_ref, p_ref, mb_ref, vec_ref, wv1_ref, wv2_ref, sc_ref,
                xout_ref, pout_ref, *, skcol, lp_valid, lp_pad):
    """Fused GATLayer forward for one batch block.

    x_ref:   (bblk, Lxp, Hp)   ra1 query side / ra2 key-value side (pre x_new)
    p_ref:   (bblk, Lpp, Hp)   ra1 key-value side / ra2 query side
    mb_ref:  (bblk, Lxp, 1)    additive mask bias for ra2 ((mask-1)*1e9)
    vec_ref: (8, Hp) rows: [bv1, wg1_o, wg1_o+wg1_p, bv2, wg2_o, wg2_o+wg2_p,
                            wk1_vec, wk2_vec]
    wv*_ref: (Hp, Hp)  value projections (in, out), zero-padded; column
                       `skcol` holds wk_vec (score key weights) when skcol set
    sc_ref:  (2,) SMEM: [gate bias 1, gate bias 2]
    """
    bblk, lxp, Hp = x_ref.shape
    lpp = p_ref.shape[1]

    x = x_ref[...]
    p = p_ref[...]

    bv1, wg1o, wg1s = vec_ref[0:1, :], vec_ref[1:2, :], vec_ref[2:3, :]
    bv2, wg2o, wg2s = vec_ref[3:4, :], vec_ref[4:5, :], vec_ref[5:6, :]
    wk1, wk2 = vec_ref[6:7, :], vec_ref[7:8, :]
    bg1, bg2 = sc_ref[0], sc_ref[1]

    def relation_stage(q, kv, wv_ref, bv, wgo, wgs, bg, wk_row, bias):
        # Value projection: one MXU matmul on the flattened batch block.  The
        # padded column `skcol` of wv simultaneously produces sk = kv . wk_vec.
        m = kv.shape[0] * kv.shape[1]
        v = (jnp.dot(kv.reshape(m, Hp), wv_ref[...],
                     preferred_element_type=jnp.float32)
             + bv).reshape(kv.shape)                       # (bblk, Lkv, Hp)
        if skcol is not None:
            sk = v[:, :, skcol:skcol + 1]                  # (bblk, Lkv, 1)
        else:  # no spare padded lane (H multiple of 128): explicit reduce
            sk = jnp.sum(kv * wk_row[None], axis=-1, keepdims=True)
        if bias is not None:
            sk = sk + bias
        # Softmax over key positions; the q-side score terms are constant
        # along this axis and cancel, so the weights are shared by every
        # query row -> a single per-batch context vector.
        sk = sk - jnp.max(sk, axis=1, keepdims=True)
        e = jnp.exp(sk)
        attn = e / jnp.sum(e, axis=1, keepdims=True)       # (bblk, Lkv, 1)
        ctx = jnp.sum(attn * v, axis=1)                    # (bblk, Hp)
        out = ctx[:, None, :] + q                          # (bblk, Lq, Hp)
        # gate(cat([out, q])) with out = ctx + q  ->  ctx.wg_o + q.(wg_o+wg_p)
        g_logit = (jnp.sum(ctx * wgo, axis=-1, keepdims=True)[:, :, None]
                   + jnp.sum(q * wgs[None], axis=-1, keepdims=True) + bg)
        g = jax.nn.sigmoid(g_logit)                        # (bblk, Lq, 1)
        return g * out + (1.0 - g) * q

    # ---- ra1: query = x, key/value = p (mask=None in the module) ----------
    if lp_pad > lp_valid:   # exclude zero-padded key rows (static constant)
        lidx = jax.lax.broadcasted_iota(jnp.int32, (1, lp_pad, 1), 1)
        bias1 = jnp.where(lidx < lp_valid, 0.0, -1.0e9)
    else:
        bias1 = None
    x_new = relation_stage(x, p, wv1_ref, bv1, wg1o, wg1s, bg1, wk1, bias1) + x
    xout_ref[...] = x_new

    # ---- ra2: query = p, key/value = x_new (user mask as additive bias) ---
    p_new = relation_stage(p, x_new, wv2_ref, bv2, wg2o, wg2s, bg2, wk2,
                           mb_ref[...]) + p
    pout_ref[...] = p_new


def fuse_gat_params(ra1_params, ra2_params, Hp):
    """Fold the q/k score projections away; pad & pack weights for the kernel."""
    def prep(params):
        wq, bq, wk, bk, wv, bv, ws, bs, wg, bg = params
        H = wv.shape[0]
        # wq, bq, ws[:, :H], bk.ws_k, bs are constant along the softmax axis
        # and cancel after max-subtraction -> intentionally dropped.
        wk_vec = wk @ ws[0, H:]                            # (H,)
        wg_o, wg_p = wg[0, :H], wg[0, H:]
        wv_pad = jnp.pad(wv, ((0, Hp - H), (0, Hp - H)))   # (Hp, Hp)
        if H < Hp:
            # Stash wk_vec in a free padded column: sk comes out of the MXU.
            wv_pad = wv_pad.at[:H, H].set(wk_vec)
        return wk_vec, bv[0], wg_o, wg_o + wg_p, wv_pad, bg[0, 0]

    wk1, bv1, wg1o, wg1s, wv1_pad, bg1 = prep(ra1_params)
    wk2, bv2, wg2o, wg2s, wv2_pad, bg2 = prep(ra2_params)
    H = bv1.shape[0]
    pad1 = lambda a: jnp.pad(a, (0, Hp - H))
    vec_pack = jnp.stack([pad1(bv1), pad1(wg1o), pad1(wg1s),
                          pad1(bv2), pad1(wg2o), pad1(wg2s),
                          pad1(wk1), pad1(wk2)]).astype(jnp.float32)   # (8, Hp)
    scalars = jnp.stack([bg1, bg2]).astype(jnp.float32)                # (2,)
    return vec_pack, wv1_pad.astype(jnp.float32), wv2_pad.astype(jnp.float32), scalars


def gat_layer(x, p, mask, ra1_params, ra2_params):
    """GATLayer.forward(x, p, mask) -> (x, p), single fused pallas_call."""
    B, Lx, H = x.shape
    Lp = p.shape[1]
    Hp = _round_up(H, 128)        # lane-dense blocks / stores
    Lxp = _round_up(Lx, 8)        # sublane-dense blocks / stores
    Lpp = _round_up(Lp, 8)

    x_pad = jnp.pad(x, ((0, 0), (0, Lxp - Lx), (0, Hp - H)))
    p_pad = jnp.pad(p, ((0, 0), (0, Lpp - Lp), (0, Hp - H)))
    # Additive mask bias for ra2; padded x tokens get mask 0 -> -1e9 bias.
    mask_pad = jnp.pad(mask.astype(jnp.float32), ((0, 0), (0, Lxp - Lx)))
    mask_bias = ((mask_pad - 1.0) * 1.0e9).reshape(B, Lxp, 1)

    vec_pack, wv1_pad, wv2_pad, scalars = fuse_gat_params(ra1_params,
                                                          ra2_params, Hp)

    # Single grid step on 1-TC chips (v5e/v6e); split the batch into two
    # "parallel" steps only when the device exposes more than one TensorCore.
    ncores = _num_tensorcores()
    bblk = B // 2 if (ncores > 1 and B >= 2 and B % 2 == 0) else B
    nsteps = B // bblk

    skcol = H if H < Hp else None
    kernel = functools.partial(_gat_kernel, skcol=skcol,
                               lp_valid=Lp, lp_pad=Lpp)

    batch_map = lambda b: (b, 0, 0)
    const2 = lambda b: (0, 0)

    x_new, p_new = pl.pallas_call(
        kernel,
        out_shape=(jax.ShapeDtypeStruct((B, Lxp, Hp), jnp.float32),
                   jax.ShapeDtypeStruct((B, Lpp, Hp), jnp.float32)),
        grid=(nsteps,),
        in_specs=[
            pl.BlockSpec((bblk, Lxp, Hp), batch_map),             # x
            pl.BlockSpec((bblk, Lpp, Hp), batch_map),             # p
            pl.BlockSpec((bblk, Lxp, 1), batch_map),              # mask bias
            pl.BlockSpec((8, Hp), const2),                        # packed vectors
            pl.BlockSpec((Hp, Hp), const2),                       # Wv (ra1)
            pl.BlockSpec((Hp, Hp), const2),                       # Wv (ra2)
            pl.BlockSpec(memory_space=pltpu.MemorySpace.SMEM),    # gate biases
        ],
        out_specs=(pl.BlockSpec((bblk, Lxp, Hp), batch_map),      # x_new
                   pl.BlockSpec((bblk, Lpp, Hp), batch_map)),     # p_new
        compiler_params=pltpu.CompilerParams(
            dimension_semantics=("parallel",)),
    )(x_pad, p_pad, mask_bias, vec_pack, wv1_pad, wv2_pad, scalars)

    return x_new[:, :Lx, :H], p_new[:, :Lp, :H]


def init_ra_params(key, H):
    """Deterministic init mimicking nn.Linear's U(-1/sqrt(fan_in), 1/sqrt(fan_in))."""
    ks = jax.random.split(key, 10)
    b1 = 1.0 / math.sqrt(H)
    b2 = 1.0 / math.sqrt(2 * H)
    u = lambda k, shape, bd: jax.random.uniform(k, shape, jnp.float32, -bd, bd)
    wq = u(ks[0], (H, H), b1); bq = u(ks[1], (1, H), b1)
    wk = u(ks[2], (H, H), b1); bk = u(ks[3], (1, H), b1)
    wv = u(ks[4], (H, H), b1); bv = u(ks[5], (1, H), b1)
    ws = u(ks[6], (1, 2 * H), b2); bs = u(ks[7], (1, 1), b2)
    wg = u(ks[8], (1, 2 * H), b2); bg = u(ks[9], (1, 1), b2)
    return (wq, bq, wk, bk, wv, bv, ws, bs, wg, bg)


def _ra_reference(p, x, mask, params):
    """Pure-JAX reference of RelationAttention.forward for validation."""
    wq, bq, wk, bk, wv, bv, ws, bs, wg, bg = params
    H = p.shape[-1]
    q = p @ wq + bq
    k = x @ wk + bk
    v = x @ wv + bv
    sq = jnp.einsum('bch,h->bc', q, ws[0, :H])
    sk = jnp.einsum('blh,h->bl', k, ws[0, H:])
    score = sq[:, :, None] + sk[:, None, :] + bs[0, 0]
    score = jnp.where(mask[:, None, :] == 0.0, -1.0e9, score)
    attn = jax.nn.softmax(score, axis=2)
    out = jnp.einsum('bcl,bld->bcd', attn, v) + p
    g = jax.nn.sigmoid(jnp.einsum('bch,h->bc', out, wg[0, :H])[..., None]
                       + jnp.einsum('bch,h->bc', p, wg[0, H:])[..., None]
                       + bg[0, 0])
    return g * out + (1.0 - g) * p


if __name__ == "__main__":
    B, Lx, Lp, H = 2, 8, 6, 32
    key = jax.random.PRNGKey(0)
    kx, kp, k1, k2 = jax.random.split(key, 4)

    x = jax.random.normal(kx, (B, Lx, H), jnp.float32)
    p = jax.random.normal(kp, (B, Lp, H), jnp.float32)
    ra1_params = init_ra_params(k1, H)
    ra2_params = init_ra_params(k2, H)
    # mask over x-tokens (used by ra2, as in the PyTorch module): 1 = keep
    mask = jnp.array([[1, 1, 1, 1, 1, 0, 0, 0],
                      [1, 1, 1, 0, 0, 0, 0, 0]], jnp.float32)

    x_out, p_out = gat_layer(x, p, mask, ra1_params, ra2_params)
    jax.block_until_ready((x_out, p_out))

    # validate against a pure-JAX reference of the PyTorch forward
    ones_mask = jnp.ones((B, Lp), jnp.float32)
    x_ref = _ra_reference(x, p, ones_mask, ra1_params) + x
    p_ref = _ra_reference(p, x_ref, mask, ra2_params) + p
    assert jnp.allclose(x_out, x_ref, atol=1e-4, rtol=1e-4)
    assert jnp.allclose(p_out, p_ref, atol=1e-4, rtol=1e-4)

    print("KERNEL_OK")
</pallas_src>

<mosaic_0001>
module attributes {stable_mosaic.version = 11 : i64} {
  func.func @_gat_kernel(%arg0: i32, %arg1: memref<2x8x128xf32, #tpu.memory_space<vmem>>, %arg2: memref<2x8x128xf32, #tpu.memory_space<vmem>>, %arg3: memref<2x8x1xf32, #tpu.memory_space<vmem>>, %arg4: memref<8x128xf32, #tpu.memory_space<vmem>>, %arg5: memref<128x128xf32, #tpu.memory_space<vmem>>, %arg6: memref<128x128xf32, #tpu.memory_space<vmem>>, %arg7: memref<2xf32, #tpu.memory_space<smem>>, %arg8: memref<2x8x128xf32, #tpu.memory_space<vmem>>, %arg9: memref<2x8x128xf32, #tpu.memory_space<vmem>>) attributes {dimension_semantics = [#tpu.dimension_semantics<parallel>], iteration_bounds = array<i64: 1>, scalar_prefetch = 0 : i64, scratch_operands = 0 : i64, tpu.core_type = #tpu.core_type<tc>, window_params = [{transform_indices = @transform_0, window_bounds = array<i64: 2, 8, 128>}, {transform_indices = @transform_1, window_bounds = array<i64: 2, 8, 128>}, {transform_indices = @transform_2, window_bounds = array<i64: 2, 8, 1>}, {pipeline_mode = #tpu.pipeline_mode<synchronous>, transform_indices = @transform_3, window_bounds = array<i64: 8, 128>}, {pipeline_mode = #tpu.pipeline_mode<synchronous>, transform_indices = @transform_4, window_bounds = array<i64: 128, 128>}, {pipeline_mode = #tpu.pipeline_mode<synchronous>, transform_indices = @transform_5, window_bounds = array<i64: 128, 128>}, {transform_indices = @transform_6, window_bounds = array<i64: 2>}, {transform_indices = @transform_7, window_bounds = array<i64: 2, 8, 128>}, {transform_indices = @transform_8, window_bounds = array<i64: 2, 8, 128>}]} {
    %c0 = arith.constant 0 : index
    %c0_0 = arith.constant 0 : index
    %c0_1 = arith.constant 0 : index
    %0 = vector.load %arg1[%c0, %c0_0, %c0_1] : memref<2x8x128xf32, #tpu.memory_space<vmem>>, vector<2x8x128xf32>
    %c0_2 = arith.constant 0 : index
    %c0_3 = arith.constant 0 : index
    %c0_4 = arith.constant 0 : index
    %1 = vector.load %arg2[%c0_2, %c0_3, %c0_4] : memref<2x8x128xf32, #tpu.memory_space<vmem>>, vector<2x8x128xf32>
    %c0_5 = arith.constant 0 : index
    %c0_6 = arith.constant 0 : index
    %2 = vector.load %arg4[%c0_5, %c0_6] : memref<8x128xf32, #tpu.memory_space<vmem>>, vector<1x128xf32>
    %c1 = arith.constant 1 : index
    %c0_7 = arith.constant 0 : index
    %3 = vector.load %arg4[%c1, %c0_7] : memref<8x128xf32, #tpu.memory_space<vmem>>, vector<1x128xf32>
    %c2 = arith.constant 2 : index
    %c0_8 = arith.constant 0 : index
    %4 = vector.load %arg4[%c2, %c0_8] : memref<8x128xf32, #tpu.memory_space<vmem>>, vector<1x128xf32>
    %c3 = arith.constant 3 : index
    %c0_9 = arith.constant 0 : index
    %5 = vector.load %arg4[%c3, %c0_9] : memref<8x128xf32, #tpu.memory_space<vmem>>, vector<1x128xf32>
    %c4 = arith.constant 4 : index
    %c0_10 = arith.constant 0 : index
    %6 = vector.load %arg4[%c4, %c0_10] : memref<8x128xf32, #tpu.memory_space<vmem>>, vector<1x128xf32>
    %c5 = arith.constant 5 : index
    %c0_11 = arith.constant 0 : index
    %7 = vector.load %arg4[%c5, %c0_11] : memref<8x128xf32, #tpu.memory_space<vmem>>, vector<1x128xf32>
    %c0_12 = arith.constant 0 : index
    %8 = memref.load %arg7[%c0_12] : memref<2xf32, #tpu.memory_space<smem>>
    %c1_13 = arith.constant 1 : index
    %9 = memref.load %arg7[%c1_13] : memref<2xf32, #tpu.memory_space<smem>>
    %10 = tpu.iota {dimensions = array<i32: 1>} : vector<1x8x1xi32>
    %c6_i32 = arith.constant 6 : i32
    %11 = vector.broadcast %c6_i32 : i32 to vector<1x8x1xi32>
    %12 = arith.cmpi slt, %10, %11 : vector<1x8x1xi32>
    %cst = arith.constant 0.000000e+00 : f32
    %cst_14 = arith.constant -1.000000e+09 : f32
    %13 = vector.broadcast %cst : f32 to vector<1x8x1xf32>
    %14 = vector.broadcast %cst_14 : f32 to vector<1x8x1xf32>
    %15 = arith.select %12, %13, %14 : vector<1x8x1xi1>, vector<1x8x1xf32>
    %16 = vector.shape_cast %1 : vector<2x8x128xf32> to vector<16x128xf32>
    %c0_15 = arith.constant 0 : index
    %c0_16 = arith.constant 0 : index
    %17 = vector.load %arg5[%c0_15, %c0_16] : memref<128x128xf32, #tpu.memory_space<vmem>>, vector<128x128xf32>
    %cst_17 = arith.constant dense<0.000000e+00> : vector<16x128xf32>
    %18 = tpu.matmul %16, %17, %cst_17 {dimension_numbers = #tpu.dot_dimension_numbers<[1], [0], [0], [1], [0, 0, 1, 1], [], []>} : vector<16x128xf32>, vector<128x128xf32>, vector<16x128xf32> -> vector<16x128xf32>
    %19 = vector.broadcast %2 : vector<1x128xf32> to vector<16x128xf32>
    %20 = arith.addf %18, %19 : vector<16x128xf32>
    %21 = vector.shape_cast %20 : vector<16x128xf32> to vector<2x8x128xf32>
    %22 = vector.extract_strided_slice %21 {offsets = [0, 0, 32], sizes = [2, 8, 1], strides = [1, 1, 1]} : vector<2x8x128xf32> to vector<2x8x1xf32>
    %23 = vector.broadcast %15 : vector<1x8x1xf32> to vector<2x8x1xf32>
    %24 = arith.addf %22, %23 : vector<2x8x1xf32>
    %cst_18 = arith.constant dense<0xFF800000> : vector<2x1xf32>
    %25 = vector.multi_reduction <maximumf>, %24, %cst_18 [1] : vector<2x8x1xf32> to vector<2x1xf32>
    %26 = vector.shape_cast %25 : vector<2x1xf32> to vector<2x1x1xf32>
    %27 = vector.broadcast %26 : vector<2x1x1xf32> to vector<2x8x1xf32>
    %28 = arith.subf %24, %27 : vector<2x8x1xf32>
    %29 = math.exp %28 : vector<2x8x1xf32>
    %cst_19 = arith.constant dense<0.000000e+00> : vector<2x1xf32>
    %30 = vector.multi_reduction <add>, %29, %cst_19 [1] : vector<2x8x1xf32> to vector<2x1xf32>
    %31 = vector.shape_cast %30 : vector<2x1xf32> to vector<2x1x1xf32>
    %32 = vector.broadcast %31 : vector<2x1x1xf32> to vector<2x8x1xf32>
    %33 = arith.divf %29, %32 : vector<2x8x1xf32>
    %34 = vector.broadcast %33 : vector<2x8x1xf32> to vector<2x8x128xf32>
    %35 = arith.mulf %34, %21 : vector<2x8x128xf32>
    %cst_20 = arith.constant dense<0.000000e+00> : vector<2x128xf32>
    %36 = vector.multi_reduction <add>, %35, %cst_20 [1] : vector<2x8x128xf32> to vector<2x128xf32>
    %37 = vector.shape_cast %36 : vector<2x128xf32> to vector<2x1x128xf32>
    %38 = vector.broadcast %37 : vector<2x1x128xf32> to vector<2x8x128xf32>
    %39 = arith.addf %38, %0 : vector<2x8x128xf32>
    %40 = vector.broadcast %3 : vector<1x128xf32> to vector<2x128xf32>
    %41 = arith.mulf %36, %40 : vector<2x128xf32>
    %cst_21 = arith.constant dense<0.000000e+00> : vector<2xf32>
    %42 = vector.multi_reduction <add>, %41, %cst_21 [1] : vector<2x128xf32> to vector<2xf32>
    %43 = vector.shape_cast %42 : vector<2xf32> to vector<2x1xf32>
    %44 = vector.shape_cast %43 : vector<2x1xf32> to vector<2x1x1xf32>
    %45 = vector.shape_cast %4 : vector<1x128xf32> to vector<1x1x128xf32>
    %46 = vector.broadcast %45 : vector<1x1x128xf32> to vector<2x8x128xf32>
    %47 = arith.mulf %0, %46 : vector<2x8x128xf32>
    %cst_22 = arith.constant dense<0.000000e+00> : vector<2x8xf32>
    %48 = vector.multi_reduction <add>, %47, %cst_22 [2] : vector<2x8x128xf32> to vector<2x8xf32>
    %49 = vector.shape_cast %48 : vector<2x8xf32> to vector<2x8x1xf32>
    %50 = vector.broadcast %44 : vector<2x1x1xf32> to vector<2x8x1xf32>
    %51 = arith.addf %50, %49 : vector<2x8x1xf32>
    %52 = vector.broadcast %8 : f32 to vector<2x8x1xf32>
    %53 = arith.addf %51, %52 : vector<2x8x1xf32>
    %54 = arith.negf %53 : vector<2x8x1xf32>
    %55 = math.exp %54 : vector<2x8x1xf32>
    %cst_23 = arith.constant 1.000000e+00 : f32
    %56 = vector.broadcast %cst_23 : f32 to vector<2x8x1xf32>
    %57 = arith.addf %56, %55 : vector<2x8x1xf32>
    %58 = arith.divf %56, %57 : vector<2x8x1xf32>
    %59 = vector.broadcast %58 : vector<2x8x1xf32> to vector<2x8x128xf32>
    %60 = arith.mulf %59, %39 : vector<2x8x128xf32>
    %cst_24 = arith.constant 1.000000e+00 : f32
    %61 = vector.broadcast %cst_24 : f32 to vector<2x8x1xf32>
    %62 = arith.subf %61, %58 : vector<2x8x1xf32>
    %63 = vector.broadcast %62 : vector<2x8x1xf32> to vector<2x8x128xf32>
    %64 = arith.mulf %63, %0 : vector<2x8x128xf32>
    %65 = arith.addf %60, %64 : vector<2x8x128xf32>
    %66 = arith.addf %65, %0 : vector<2x8x128xf32>
    %c0_25 = arith.constant 0 : index
    %c0_26 = arith.constant 0 : index
    %c0_27 = arith.constant 0 : index
    %67 = vector.load %arg8[%c0_25, %c0_26, %c0_27] : memref<2x8x128xf32, #tpu.memory_space<vmem>>, vector<2x8x128xf32>
    tpu.vector_store %arg8[%c0_25, %c0_26, %c0_27], %66 {strides = array<i32>} : memref<2x8x128xf32, #tpu.memory_space<vmem>>, vector<2x8x128xf32>,
    %c0_28 = arith.constant 0 : index
    %c0_29 = arith.constant 0 : index
    %c0_30 = arith.constant 0 : index
    %68 = vector.load %arg3[%c0_28, %c0_29, %c0_30] : memref<2x8x1xf32, #tpu.memory_space<vmem>>, vector<2x8x1xf32>
    %69 = vector.shape_cast %66 : vector<2x8x128xf32> to vector<16x128xf32>
    %c0_31 = arith.constant 0 : index
    %c0_32 = arith.constant 0 : index
    %70 = vector.load %arg6[%c0_31, %c0_32] : memref<128x128xf32, #tpu.memory_space<vmem>>, vector<128x128xf32>
    %cst_33 = arith.constant dense<0.000000e+00> : vector<16x128xf32>
    %71 = tpu.matmul %69, %70, %cst_33 {dimension_numbers = #tpu.dot_dimension_numbers<[1], [0], [0], [1], [0, 0, 1, 1], [], []>} : vector<16x128xf32>, vector<128x128xf32>, vector<16x128xf32> -> vector<16x128xf32>
    %72 = vector.broadcast %5 : vector<1x128xf32> to vector<16x128xf32>
    %73 = arith.addf %71, %72 : vector<16x128xf32>
    %74 = vector.shape_cast %73 : vector<16x128xf32> to vector<2x8x128xf32>
    %75 = vector.extract_strided_slice %74 {offsets = [0, 0, 32], sizes = [2, 8, 1], strides = [1, 1, 1]} : vector<2x8x128xf32> to vector<2x8x1xf32>
    %76 = arith.addf %75, %68 : vector<2x8x1xf32>
    %cst_34 = arith.constant dense<0xFF800000> : vector<2x1xf32>
    %77 = vector.multi_reduction <maximumf>, %76, %cst_34 [1] : vector<2x8x1xf32> to vector<2x1xf32>
    %78 = vector.shape_cast %77 : vector<2x1xf32> to vector<2x1x1xf32>
    %79 = vector.broadcast %78 : vector<2x1x1xf32> to vector<2x8x1xf32>
    %80 = arith.subf %76, %79 : vector<2x8x1xf32>
    %81 = math.exp %80 : vector<2x8x1xf32>
    %cst_35 = arith.constant dense<0.000000e+00> : vector<2x1xf32>
    %82 = vector.multi_reduction <add>, %81, %cst_35 [1] : vector<2x8x1xf32> to vector<2x1xf32>
    %83 = vector.shape_cast %82 : vector<2x1xf32> to vector<2x1x1xf32>
    %84 = vector.broadcast %83 : vector<2x1x1xf32> to vector<2x8x1xf32>
    %85 = arith.divf %81, %84 : vector<2x8x1xf32>
    %86 = vector.broadcast %85 : vector<2x8x1xf32> to vector<2x8x128xf32>
    %87 = arith.mulf %86, %74 : vector<2x8x128xf32>
    %cst_36 = arith.constant dense<0.000000e+00> : vector<2x128xf32>
    %88 = vector.multi_reduction <add>, %87, %cst_36 [1] : vector<2x8x128xf32> to vector<2x128xf32>
    %89 = vector.shape_cast %88 : vector<2x128xf32> to vector<2x1x128xf32>
    %90 = vector.broadcast %89 : vector<2x1x128xf32> to vector<2x8x128xf32>
    %91 = arith.addf %90, %1 : vector<2x8x128xf32>
    %92 = vector.broadcast %6 : vector<1x128xf32> to vector<2x128xf32>
    %93 = arith.mulf %88, %92 : vector<2x128xf32>
    %cst_37 = arith.constant dense<0.000000e+00> : vector<2xf32>
    %94 = vector.multi_reduction <add>, %93, %cst_37 [1] : vector<2x128xf32> to vector<2xf32>
    %95 = vector.shape_cast %94 : vector<2xf32> to vector<2x1xf32>
    %96 = vector.shape_cast %95 : vector<2x1xf32> to vector<2x1x1xf32>
    %97 = vector.shape_cast %7 : vector<1x128xf32> to vector<1x1x128xf32>
    %98 = vector.broadcast %97 : vector<1x1x128xf32> to vector<2x8x128xf32>
    %99 = arith.mulf %1, %98 : vector<2x8x128xf32>
    %cst_38 = arith.constant dense<0.000000e+00> : vector<2x8xf32>
    %100 = vector.multi_reduction <add>, %99, %cst_38 [2] : vector<2x8x128xf32> to vector<2x8xf32>
    %101 = vector.shape_cast %100 : vector<2x8xf32> to vector<2x8x1xf32>
    %102 = vector.broadcast %96 : vector<2x1x1xf32> to vector<2x8x1xf32>
    %103 = arith.addf %102, %101 : vector<2x8x1xf32>
    %104 = vector.broadcast %9 : f32 to vector<2x8x1xf32>
    %105 = arith.addf %103, %104 : vector<2x8x1xf32>
    %106 = arith.negf %105 : vector<2x8x1xf32>
    %107 = math.exp %106 : vector<2x8x1xf32>
    %cst_39 = arith.constant 1.000000e+00 : f32
    %108 = vector.broadcast %cst_39 : f32 to vector<2x8x1xf32>
    %109 = arith.addf %108, %107 : vector<2x8x1xf32>
    %110 = arith.divf %108, %109 : vector<2x8x1xf32>
    %111 = vector.broadcast %110 : vector<2x8x1xf32> to vector<2x8x128xf32>
    %112 = arith.mulf %111, %91 : vector<2x8x128xf32>
    %cst_40 = arith.constant 1.000000e+00 : f32
    %113 = vector.broadcast %cst_40 : f32 to vector<2x8x1xf32>
    %114 = arith.subf %113, %110 : vector<2x8x1xf32>
    %115 = vector.broadcast %114 : vector<2x8x1xf32> to vector<2x8x128xf32>
    %116 = arith.mulf %115, %1 : vector<2x8x128xf32>
    %117 = arith.addf %112, %116 : vector<2x8x128xf32>
    %118 = arith.addf %117, %1 : vector<2x8x128xf32>
    %c0_41 = arith.constant 0 : index
    %c0_42 = arith.constant 0 : index
    %c0_43 = arith.constant 0 : index
    %119 = vector.load %arg9[%c0_41, %c0_42, %c0_43] : memref<2x8x128xf32, #tpu.memory_space<vmem>>, vector<2x8x128xf32>
    tpu.vector_store %arg9[%c0_41, %c0_42, %c0_43], %118 {strides = array<i32>} : memref<2x8x128xf32, #tpu.memory_space<vmem>>, vector<2x8x128xf32>,
    return
  }
  func.func @transform_0(%arg0: i32) -> (i32, i32, i32) {
    %c0_i32 = arith.constant 0 : i32
    %c0_i32_0 = arith.constant 0 : i32
    %c0_i32_1 = arith.constant 0 : i32
    return %arg0, %c0_i32, %c0_i32_0 : i32, i32, i32
  }
  func.func @transform_1(%arg0: i32) -> (i32, i32, i32) {
    %c0_i32 = arith.constant 0 : i32
    %c0_i32_0 = arith.constant 0 : i32
    %c0_i32_1 = arith.constant 0 : i32
    return %arg0, %c0_i32, %c0_i32_0 : i32, i32, i32
  }
  func.func @transform_2(%arg0: i32) -> (i32, i32, i32) {
    %c0_i32 = arith.constant 0 : i32
    %c0_i32_0 = arith.constant 0 : i32
    %c0_i32_1 = arith.constant 0 : i32
    return %arg0, %c0_i32, %c0_i32_0 : i32, i32, i32
  }
  func.func @transform_3(%arg0: i32) -> (i32, i32) {
    %c0_i32 = arith.constant 0 : i32
    %c0_i32_0 = arith.constant 0 : i32
    %c0_i32_1 = arith.constant 0 : i32
    return %c0_i32, %c0_i32_0 : i32, i32
  }
  func.func @transform_4(%arg0: i32) -> (i32, i32) {
    %c0_i32 = arith.constant 0 : i32
    %c0_i32_0 = arith.constant 0 : i32
    %c0_i32_1 = arith.constant 0 : i32
    return %c0_i32, %c0_i32_0 : i32, i32
  }
  func.func @transform_5(%arg0: i32) -> (i32, i32) {
    %c0_i32 = arith.constant 0 : i32
    %c0_i32_0 = arith.constant 0 : i32
    %c0_i32_1 = arith.constant 0 : i32
    return %c0_i32, %c0_i32_0 : i32, i32
  }
  func.func @transform_6(%arg0: i32) -> i32 {
    %c0_i32 = arith.constant 0 : i32
    %c0_i32_0 = arith.constant 0 : i32
    return %c0_i32 : i32
  }
  func.func @transform_7(%arg0: i32) -> (i32, i32, i32) {
    %c0_i32 = arith.constant 0 : i32
    %c0_i32_0 = arith.constant 0 : i32
    %c0_i32_1 = arith.constant 0 : i32
    return %arg0, %c0_i32, %c0_i32_0 : i32, i32, i32
  }
  func.func @transform_8(%arg0: i32) -> (i32, i32, i32) {
    %c0_i32 = arith.constant 0 : i32
    %c0_i32_0 = arith.constant 0 : i32
    %c0_i32_1 = arith.constant 0 : i32
    return %arg0, %c0_i32, %c0_i32_0 : i32, i32, i32
  }
}

</mosaic_0001>

<bundles_post_ra>
// kernel: tpu_custom_call.1
= control target key start
LH: loop header
LB: loop body
LE: loop exit
PB: predicated region body
PF: predicated region fallthrough
CT: control target
= control target key end

     0   :  { %14 = vsyncpa [#allocation3], 0  ;;  %s1082_s0 = inlined_call_operand.vmem [shape: f32[2,8,128], index: 0, kind: input, shape index: {}]   ;;  %s1083_s1 = inlined_call_operand.hbm [shape: f32[2,8,128], index: 1, kind: input, shape index: {}]   ;;  %s1084_s2 = inlined_call_operand.vmem [shape: f32[2,8,1], index: 2, kind: input, shape index: {}]   ;;  %s1085_s3 = inlined_call_operand.hbm [shape: f32[8,128], index: 3, kind: input, shape index: {}]   ;;  %s1086_s4 = inlined_call_operand.hbm [shape: f32[128,128], index: 4, kind: input, shape index: {}]   ;;  %s1087_s5 = inlined_call_operand.hbm [shape: f32[128,128], index: 5, kind: input, shape index: {}]   ;;  %s1088_s6 = inlined_call_operand.vmem [shape: f32[2], index: 6, kind: input, shape index: {}]   ;;  %s1089_s7 = inlined_call_operand.hbm [shape: f32[2,8,128], index: 7, kind: output, shape index: {0}]   ;;  %s1090_s8 = inlined_call_operand.hbm [shape: f32[2,8,128], index: 8, kind: output, shape index: {1}]  }
   0x1   :  { %15 = vsyncpa [#allocation7], 0 }
   0x2   :  { %16 = vsyncpa [#allocation10], 0 }
   0x3   :  { %17 = vsyncpa [#allocation5], 0 }
   0x4   :  { %18 = vsyncpa [#allocation4], 0 }
   0x5   :  { %19 = vsyncpa [#allocation14], 0  ;;  %s918_s27 = smov [#allocation6]   ;;  %s919_s29 = smov [#allocation2]  }
   0x6   :  { %s42_s28 = sshll.u32 %s918_s27, 4  ;;  %s27_s30 = sshll.u32 %s919_s29, 4  ;;  %s43_s28 = int_to_ptr.vmem [resolvable:$true] %s42_s28  ;;  %s28_s30 = int_to_ptr.vmem [resolvable:$true] %s27_s30 }
   0x7   :  { %s782_s9 = scalar_lea.vmem %s43_s28, 128  ;;  %p787_p1 = scmp.lt.s32.totalorder %s43_s28, %s43_s28 }
   0x8   :  { %p783_p0 = scmp.ne.s32.totalorder %s43_s28, %s782_s9  ;;  %p788_p2 = scmp.lt.s32.totalorder %s782_s9, %s782_s9 }
   0xa   :  { %p789_p3 = por %p788_p2, %p787_p1 }
   0xc   :  { %p790_p4 = pnand %p789_p3, %p783_p0 }
   0xe   :  { %793 = shalt.err (!%p790_p4)
}
   0xf   :  { %45 = dma.hbm_to_vmem [thread:$0]  %s1085_s3, 128, %s43_s28, [#allocation7]  }
  0x10   :  { %s802_s12 = scalar_lea.vmem %s28_s30, 256  ;;  %p807_p6 = scmp.lt.s32.totalorder %s28_s30, %s28_s30 }
  0x11   :  { %p803_p5 = scmp.ne.s32.totalorder %s28_s30, %s802_s12  ;;  %p808_p7 = scmp.lt.s32.totalorder %s802_s12, %s802_s12 }
  0x13   :  { %p809_p8 = por %p808_p7, %p807_p6 }
  0x15   :  { %p810_p9 = pnand %p809_p8, %p803_p5 }
  0x17   :  { %813 = shalt.err (!%p810_p9)
}
  0x18   :  { %s920_s13 = smov 128   ;;  %s921_s14 = smov 8  }
  0x19   :  { %33 = dma.hbm_to_vmem [thread:$0]  %s1083_s1, 256, %s28_s30, [#allocation3], %s920_s13, %s920_s13, %s921_s14  }
  0x1a   :  { %s922_s17 = smov [#allocation8]   ;;  %s923_s19 = smov [#allocation9]  }
  0x1b   :  { %s51_s18 = sshll.u32 %s922_s17, 4  ;;  %s63_s3 = sshll.u32 %s923_s19, 4  ;;  %s52_s18 = int_to_ptr.vmem [resolvable:$true] %s51_s18  ;;  %s64_s3 = int_to_ptr.vmem [resolvable:$true] %s63_s3 }
  0x1c   :  { %s822_s20 = scalar_lea.vmem %s52_s18, 2048  ;;  %p827_p11 = scmp.lt.s32.totalorder %s52_s18, %s52_s18 }
  0x1d   :  { %p823_p10 = scmp.ne.s32.totalorder %s52_s18, %s822_s20  ;;  %p828_p12 = scmp.lt.s32.totalorder %s822_s20, %s822_s20 }
  0x1f   :  { %p829_p13 = por %p828_p12, %p827_p11 }
  0x21   :  { %p830_p0 = pnand %p829_p13, %p823_p10 }
  0x23   :  { %833 = shalt.err (!%p830_p0)
}
  0x24   :  { %57 = dma.hbm_to_vmem [thread:$0]  %s1086_s4, 2048, %s52_s18, [#allocation7], %s920_s13, %s920_s13, %s921_s14  }
  0x25   :  { %s842_s1 = scalar_lea.vmem %s64_s3, 2048  ;;  %p847_p2 = scmp.lt.s32.totalorder %s64_s3, %s64_s3 }
  0x26   :  { %p843_p1 = scmp.ne.s32.totalorder %s64_s3, %s842_s1  ;;  %p848_p3 = scmp.lt.s32.totalorder %s842_s1, %s842_s1 }
  0x28   :  { %p849_p4 = por %p848_p3, %p847_p2 }
  0x2a   :  { %p850_p5 = pnand %p849_p4, %p843_p1 }
  0x2c   :  { %853 = shalt.err (!%p850_p5)
}
  0x2d   :  { %69 = dma.hbm_to_vmem [thread:$0]  %s1087_s5, 2048, %s64_s3, [#allocation10], %s920_s13, %s920_s13, %s921_s14  }
  0x2e   :  { %s76_s27 = sshll.u32 %s1088_s6, 4  ;;  %s77_s27 = int_to_ptr.vmem [resolvable:$true] %s76_s27 }
  0x2f   :  { %s854_s4 = scalar_lea.vmem %s77_s27, 16  ;;  %p859_p7 = scmp.lt.s32.totalorder %s77_s27, %s77_s27 }
  0x30   :  { %p855_p6 = scmp.ne.s32.totalorder %s77_s27, %s854_s4  ;;  %p860_p8 = scmp.lt.s32.totalorder %s854_s4, %s854_s4 }
  0x32   :  { %p861_p9 = por %p860_p8, %p859_p7 }
  0x34   :  { %p862_p10 = pnand %p861_p9, %p855_p6 }
  0x36   :  { %865 = shalt.err (!%p862_p10)
}
  0x37   :  { %s924_s28 = smov [#allocation11]  }
  0x38   :  { %79 = dma.vmem_to_smem %s77_s27, 16, %s924_s28, [#allocation5]  }
  0x39   :  { %906 = dma.done.wait [#allocation3], 256  }
  0x3a   :  { %907 = vsyncadd [#allocation3], 4294967040 }
  0x3b   :  { %908 = dma.done.wait [#allocation7], 2176  }
  0x3c   :  { %909 = vsyncadd [#allocation7], 4294965120 }
  0x3d   :  { %910 = dma.done.wait [#allocation10], 2048  }
  0x3e   :  { %911 = vsyncadd [#allocation10], 4294965248 }
  0x3f   :  { %912 = dma.done.wait [#allocation5], 16  }
  0x40   :  { %913 = vsyncadd [#allocation5], 4294967280 }
  0x41   :  { %95 = sfence }
  0x42   :  { %v127_v0 = vld [vmem:[#allocation8 + $0x78] sm:$0xff]  ;;  %v126_v1 = vld [vmem:[#allocation8 + $0x70] sm:$0xff]  ;;  %v125_v2 = vld [vmem:[#allocation8 + $0x68] sm:$0xff]  ;;  %v925_v18 = vmov 32   ;;  %v108_v19 = vlaneseq  ;;  %v926_v22 = vmov -1e+09  }
  0x43   :  { %658 = vmatprep.subr.mxu0 %v127_v0  ;;  %v124_v3 = vld [vmem:[#allocation8 + $0x60] sm:$0xff]  ;;  %v999_v4 = vld [vmem:[#allocation2] sm:$0xff]  ;;  %v123_v5 = vld [vmem:[#allocation8 + $0x58] sm:$0xff]  ;;  %740 = vset.pattern.permute.xlu0 %v925_v18  ;;  %vm209_vm1 = vcmask 269568   ;;  %vm283_vm2 = vcmask 1041409   ;;  %vm286_vm3 = vcmask 1041408  }
  0x44   :  { %659 = vmatpush3.msra.mxu0 %v127_v0  ;;  %690 = vmatprep.mubr.f32.mxu0 %v999_v4  ;;  %v122_v6 = vld [vmem:[#allocation8 + $0x50] sm:$0xff]  ;;  %v121_v7 = vld [vmem:[#allocation8 + $0x48] sm:$0xff]  ;;  %v120_v8 = vld [vmem:[#allocation8 + $0x40] sm:$0xff]  ;;  %v1005_v20 = vshrl.u32 %v108_v19, 7  ;;  %s927_s10 = smov 32   ;;  %s106_s15 = sld [smem:[#allocation11]] }
  0x45   :  { %660 = vmatprep.subr.mxu0 %v126_v1  ;;  %v119_v9 = vld [vmem:[#allocation8 + $0x38] sm:$0xff]  ;;  %v118_v10 = vld [vmem:[#allocation8 + $0x30] sm:$0xff]  ;;  %v117_v11 = vld [vmem:[#allocation8 + $0x28] sm:$0xff]  ;;  %741 = vset.pattern.permute.xlu1 %v925_v18 }
  0x46   :  { %661 = vmatpush3.msra.mxu0 %v126_v1  ;;  %v116_v12 = vld [vmem:[#allocation8 + $0x20] sm:$0xff]  ;;  %v115_v13 = vld [vmem:[#allocation8 + $0x18] sm:$0xff]  ;;  %v114_v14 = vld [vmem:[#allocation8 + $0x10] sm:$0xff]  ;;  %vm110_vm0 = vcmp.lt.s32.totalorder %v1005_v20, 6 }
  0x47   :  { %662 = vmatprep.subr.mxu0 %v125_v2  ;;  %v113_v15 = vld [vmem:[#allocation8 + $0x8] sm:$0xff]  ;;  %v112_v16 = vld [vmem:[#allocation8] sm:$0xff]  ;;  %v1002_v17 = vld [vmem:[#allocation2 + $0x8] sm:$0xff]  ;;  %v111_v23 = vsel %vm110_vm0, 0.0, %v926_v22 }
  0x48   :  { %663 = vmatpush3.msra.mxu0 %v125_v2  ;;  %v612_v21 = vld [vmem:[#allocation6] ss:$0 sm:$0xff]  ;;  %v613_v22 = vld [vmem:[#allocation6 + $0x1] ss:$0 sm:$0xff] }
  0x49   :  { %664 = vmatprep.subr.mxu0 %v124_v3 }
  0x4a   :  { %665 = vmatpush3.msra.mxu0 %v124_v3 }
  0x4b   :  { %666 = vmatprep.subr.mxu0 %v123_v5 }
  0x4c   :  { %667 = vmatpush3.msra.mxu0 %v123_v5  ;;  %v614_v5 = vld [vmem:[#allocation6 + $0x2] ss:$0 sm:$0xff] }
  0x4d   :  { %668 = vmatprep.subr.mxu0 %v122_v6 }
  0x4e   :  { %669 = vmatpush3.msra.mxu0 %v122_v6  ;;  %v1015_v6 = vld [vmem:[%s1082_s0 + $0x8] sm:$0xff] }
  0x4f   :  { %670 = vmatprep.subr.mxu0 %v121_v7 }
  0x50   :  { %671 = vmatpush3.msra.mxu0 %v121_v7  ;;  %v306_v7 = vmul.f32 %v614_v5, %v1015_v6 }
  0x51   :  { %672 = vmatprep.subr.mxu0 %v120_v8 }
  0x52   :  { %673 = vmatpush3.msra.mxu0 %v120_v8 }
  0x53   :  { %674 = vmatprep.subr.mxu0 %v119_v9 }
  0x54   :  { %675 = vmatpush3.msra.mxu0 %v119_v9 }
  0x55   :  { %676 = vmatprep.subr.mxu0 %v118_v10 }
  0x56   :  { %677 = vmatpush3.msra.mxu0 %v118_v10 }
  0x57   :  { %678 = vmatprep.subr.mxu0 %v117_v11 }
  0x58   :  { %679 = vmatpush3.msra.mxu0 %v117_v11 }
  0x59   :  { %680 = vmatprep.subr.mxu0 %v116_v12 }
  0x5a   :  { %681 = vmatpush3.msra.mxu0 %v116_v12 }
  0x5b   :  { %682 = vmatprep.subr.mxu0 %v115_v13 }
  0x5c   :  { %683 = vmatpush3.msra.mxu0 %v115_v13 }
  0x5d   :  { %684 = vmatprep.subr.mxu0 %v114_v14 }
  0x5e   :  { %685 = vmatpush3.msra.mxu0 %v114_v14 }
  0x5f   :  { %686 = vmatprep.subr.mxu0 %v113_v15 }
  0x60   :  { %687 = vmatpush3.msra.mxu0 %v113_v15 }
  0x61   :  { %688 = vmatprep.subr.mxu0 %v112_v16 }
  0x62   :  { %689 = vmatpush3.msra.mxu0 %v112_v16 }
  0x63   :  { %691 = vmatmul.mubr.f32.vlgmr.msra.gmra.mxu0 %v1002_v17 }
 0x123   :  { %v692_v24 = vpop.f32.mrf.mxu0 }
 0x124   :  { %v204_v25 = vadd.f32 %v692_v24, %v612_v21 }
 0x125   :  { %v198_v26 = vpop.f32.mrf.mxu0 }
 0x126   :  { %v208_v27 = vadd.f32 %v204_v25, %v111_v23  ;;  %v199_v28 = vadd.f32 %v612_v21, %v198_v26 }
 0x128   :  { %v217_v29 = vsel %vm209_vm1, %v208_v27, -inf  ;;  %v207_v30 = vadd.f32 %v199_v28, %v111_v23 }
 0x129   :  { %v218_v31 = vrot.slane %v217_v29, 4 }
 0x12a   :  { %v210_v32 = vsel %vm209_vm1, %v207_v30, -inf }
 0x12b   :  { %v219_v33 = vmax.f32 %v217_v29, %v218_v31  ;;  %v211_v34 = vrot.slane %v210_v32, 4 }
 0x12d   :  { %v220_v35 = vrot.slane %v219_v33, 2  ;;  %v212_v36 = vmax.f32 %v210_v32, %v211_v34  ;;  %v1029_v32 = vld [vmem:[%s1082_s0] sm:$0xff]  ;;  %v357_v34 = vld [vmem:[#allocation9 + $0x78] sm:$0xff] }
 0x12e   :  { %693 = vmatprep.subr.mxu1 %v357_v34 }
 0x12f   :  { %v221_v37 = vmax.f32 %v219_v33, %v220_v35  ;;  %v213_v38 = vrot.slane %v212_v36, 2  ;;  %v305_v33 = vmul.f32 %v614_v5, %v1029_v32  ;;  %694 = vmatpush3.msra.mxu1 %v357_v34  ;;  %v356_v35 = vld [vmem:[#allocation9 + $0x70] sm:$0xff] }
 0x130   :  { %695 = vmatprep.subr.mxu1 %v356_v35 }
 0x131   :  { %v222_v39 = vrot.slane %v221_v37, 1  ;;  %v214_v40 = vmax.f32 %v212_v36, %v213_v38  ;;  %696 = vmatpush3.msra.mxu1 %v356_v35  ;;  %v355_v36 = vld [vmem:[#allocation9 + $0x68] sm:$0xff]  ;;  %v353_v38 = vld [vmem:[#allocation9 + $0x58] sm:$0xff] }
 0x132   :  { %697 = vmatprep.subr.mxu1 %v355_v36 }
 0x133   :  { %v223_v41 = vmax.f32 %v221_v37, %v222_v39  ;;  %v215_v42 = vrot.slane %v214_v40, 1  ;;  %698 = vmatpush3.msra.mxu1 %v355_v36  ;;  %v354_v37 = vld [vmem:[#allocation9 + $0x60] sm:$0xff]  ;;  %v352_v39 = vld [vmem:[#allocation9 + $0x50] sm:$0xff] }
 0x134   :  { %699 = vmatprep.subr.mxu1 %v354_v37 }
 0x135   :  { %v225_v43 = vsub.f32 %v208_v27, %v223_v41  ;;  %v216_v44 = vmax.f32 %v214_v40, %v215_v42  ;;  %700 = vmatpush3.msra.mxu1 %v354_v37  ;;  %v351_v40 = vld [vmem:[#allocation9 + $0x48] sm:$0xff]  ;;  %v350_v41 = vld [vmem:[#allocation9 + $0x40] sm:$0xff]  ;;  %v349_v42 = vld [vmem:[#allocation9 + $0x38] sm:$0xff] }
 0x136   :  { %701 = vmatprep.subr.mxu1 %v353_v38 }
 0x137   :  { %v228_v45 = vmul.f32 1.442695, %v225_v43  ;;  %v224_v46 = vsub.f32 %v207_v30, %v216_v44  ;;  %702 = vmatpush3.msra.mxu1 %v353_v38  ;;  %v348_v43 = vld [vmem:[#allocation9 + $0x30] sm:$0xff]  ;;  %v347_v44 = vld [vmem:[#allocation9 + $0x28] sm:$0xff] }
 0x138   :  { %703 = vmatprep.subr.mxu1 %v352_v39 }
 0x139   :  { %742 = vpow2.f32 %v228_v45  ;;  %v226_v47 = vmul.f32 1.442695, %v224_v46  ;;  %704 = vmatpush3.msra.mxu1 %v352_v39  ;;  %v346_v45 = vld [vmem:[#allocation9 + $0x20] sm:$0xff]  ;;  %v345_v46 = vld [vmem:[#allocation9 + $0x18] sm:$0xff] }
 0x13a   :  { %705 = vmatprep.subr.mxu1 %v351_v40 }
 0x13b   :  { %744 = vpow2.f32 %v226_v47  ;;  %706 = vmatpush3.msra.mxu1 %v351_v40  ;;  %v344_v47 = vld [vmem:[#allocation9 + $0x10] sm:$0xff] }
 0x13c   :  { %707 = vmatprep.subr.mxu1 %v350_v41 }
 0x13d   :  { %708 = vmatpush3.msra.mxu1 %v350_v41 }
 0x13e   :  { %709 = vmatprep.subr.mxu1 %v349_v42 }
 0x13f   :  { %710 = vmatpush3.msra.mxu1 %v349_v42 }
 0x140   :  { %711 = vmatprep.subr.mxu1 %v348_v43 }
 0x141   :  { %712 = vmatpush3.msra.mxu1 %v348_v43 }
 0x142   :  { %713 = vmatprep.subr.mxu1 %v347_v44 }
 0x143   :  { %714 = vmatpush3.msra.mxu1 %v347_v44 }
 0x144   :  { %715 = vmatprep.subr.mxu1 %v346_v45 }
 0x145   :  { %716 = vmatpush3.msra.mxu1 %v346_v45 }
 0x146   :  { %v743_v48 = vpop.eup %742  ;;  %717 = vmatprep.subr.mxu1 %v345_v46 }
 0x147   :  { %v237_v49 = vsel %vm209_vm1, %v743_v48, 0.0  ;;  %718 = vmatpush3.msra.mxu1 %v345_v46 }
 0x148   :  { %v745_v50 = vpop.eup %744  ;;  %v238_v51 = vrot.slane %v237_v49, 4  ;;  %719 = vmatprep.subr.mxu1 %v344_v47 }
 0x149   :  { %v230_v52 = vsel %vm209_vm1, %v745_v50, 0.0  ;;  %720 = vmatpush3.msra.mxu1 %v344_v47 }
 0x14a   :  { %v231_v53 = vrot.slane %v230_v52, 4  ;;  %v239_v54 = vadd.f32 %v238_v51, %v237_v49  ;;  %v342_v49 = vld [vmem:[#allocation9] sm:$0xff]  ;;  %v340_v51 = vld [vmem:[%s1084_s2] sm:$0xff] }
 0x14c   :  { %v232_v55 = vadd.f32 %v231_v53, %v230_v52  ;;  %v240_v56 = vrot.slane %v239_v54, 2  ;;  %v297_v52 = vsub.s32 1, %v1005_v20  ;;  %v293_v53 = vsub.s32 0, %v1005_v20 }
 0x14e   :  { %v241_v57 = vadd.f32 %v240_v56, %v239_v54  ;;  %v233_v58 = vrot.slane %v232_v55, 2 }
 0x150   :  { %v242_v59 = vrot.slane %v241_v57, 1  ;;  %v234_v60 = vadd.f32 %v233_v58, %v232_v55 }
 0x152   :  { %v243_v61 = vadd.f32 %v242_v59, %v241_v57  ;;  %v235_v62 = vrot.slane %v234_v60, 1  ;;  %v313_v57 = vstv %s106_s15 }
 0x154   :  { %746 = vrcp.f32 %v243_v61  ;;  %v236_v63 = vadd.f32 %v235_v62, %v234_v60 }
 0x156   :  { %748 = vrcp.f32 %v236_v63 }
 0x161   :  { %v747_v0 = vpop.eup %746 }
 0x162   :  { %v247_v1 = vmul.f32 %v747_v0, %v743_v48  ;;  %v343_v48 = vld [vmem:[#allocation9 + $0x8] sm:$0xff] }
 0x163   :  { %v749_v2 = vpop.eup %748  ;;  %721 = vmatprep.subr.mxu1 %v343_v48 }
 0x164   :  { %255 = vperm.xlu0 %740, %v247_v1   ;;  %v245_v3 = vmul.f32 %v749_v2, %v745_v50  ;;  %722 = vmatpush3.msra.mxu1 %v343_v48  ;;  %v341_v50 = vld [vmem:[%s1084_s2 + $0x8] sm:$0xff]  ;;  %s928_s2 = smov [#allocation12]  }
 0x165   :  { %723 = vmatprep.subr.mxu1 %v342_v49  ;;  %s580_s16 = sshll.u32 %s928_s2, 4  ;;  %s581_s16 = int_to_ptr.vmem [resolvable:$true] %s580_s16 }
 0x166   :  { %724 = vmatpush3.msra.mxu1 %v342_v49  ;;  %s866_s17 = scalar_lea.vmem %s581_s16, 256  ;;  %p871_p12 = scmp.lt.s32.totalorder %s581_s16, %s581_s16 }
 0x167   :  { %p867_p11 = scmp.ne.s32.totalorder %s581_s16, %s866_s17  ;;  %p872_p13 = scmp.lt.s32.totalorder %s866_s17, %s866_s17 }
 0x168   :  { %250 = vperm.xlu0 %740, %v245_v3  }
 0x169   :  { %p873_p0 = por %p872_p13, %p871_p12 }
 0x16b   :  { %p874_p1 = pnand %p873_p0, %p867_p11 }
 0x187   :  { %309 = vadd.xlane.f32.xlu0 %v306_v7 }
 0x1df   :  { %v256_v8 = vpop.permute.xlu0 %255 }
 0x1e0   :  { %v259_v9 = vmul.f32 %v256_v8, %v204_v25 }
 0x1e2   :  { %v266_v10 = vrot.slane %v259_v9, 4 }
 0x1e3   :  { %v251_v11 = vpop.permute.xlu0 %250 }
 0x1e4   :  { %v267_v12 = vadd.f32 %v266_v10, %v259_v9  ;;  %v258_v13 = vmul.f32 %v251_v11, %v199_v28 }
 0x1e6   :  { %v268_v14 = vrot.slane %v267_v12, 2  ;;  %v260_v15 = vrot.slane %v258_v13, 4 }
 0x1e8   :  { %v269_v16 = vadd.f32 %v268_v14, %v267_v12  ;;  %v261_v18 = vadd.f32 %v260_v15, %v258_v13 }
 0x1ea   :  { %v270_v19 = vrot.slane %v269_v16, 1  ;;  %v262_v21 = vrot.slane %v261_v18, 2 }
 0x1ec   :  { %v1018_v23 = vadd.f32 %v270_v19, %v269_v16  ;;  %v263_v24 = vadd.f32 %v262_v21, %v261_v18 }
 0x1ee   :  { %v264_v26 = vrot.slane %v263_v24, 1  ;;  %v279_v27 = vmul.f32 %v613_v22, %v1018_v23  ;;  %v273_v9 = vadd.f32 %v1018_v23, %v1015_v6 }
 0x1f0   :  { %v1021_v29 = vadd.f32 %v264_v26, %v263_v24  ;;  %v282_v30 = vrot.slane %v279_v27, 7  ;;  %v617_v26 = vld [vmem:[#allocation6 + $0x3] ss:$0 sm:$0xff] }
 0x1f2   :  { %v278_v25 = vmul.f32 %v613_v22, %v1021_v29  ;;  %v272_v12 = vadd.f32 %v1021_v29, %v1029_v32 }
 0x1f4   :  { %v284_v28 = vsel %vm283_vm2, %v282_v30, %v278_v25 }
 0x1f5   :  { %v287_v31 = vsel %vm286_vm3, %v284_v28, 0.0 }
 0x1f6   :  { %288 = vadd.xlane.f32.xlu1 %v287_v31 }
 0x1fa   :  { %307 = vadd.xlane.f32.xlu1 %v305_v33 }
 0x20b   :  { %441 = vrot.lane.b32.xlu1 %v341_v50, %s927_s10 }
 0x20f   :  { %439 = vrot.lane.b32.xlu1 %v340_v51, %s927_s10 }
 0x210   :  { %v310_v55 = vpop.xlane.xlu0 %309 }
 0x27f   :  { %v289_v54 = vpop.xlane.xlu1 %288 }
 0x280   :  { %v298_v56 = vrot.slane %v289_v54, %v297_v52  ;;  %v294_v58 = vrot.slane %v289_v54, %v293_v53 }
 0x282   :  { %v312_v59 = vadd.f32 %v310_v55, %v298_v56 }
 0x283   :  { %v308_v60 = vpop.xlane.xlu1 %307 }
 0x284   :  { %v315_v61 = vadd.f32 %v313_v57, %v312_v59  ;;  %v311_v62 = vadd.f32 %v308_v60, %v294_v58 }
 0x286   :  { %v616_v63 = vmul.f32 -1.442695, %v315_v61  ;;  %v314_v0 = vadd.f32 %v313_v57, %v311_v62 }
 0x287   :  { %v442_v23 = vpop.permute.xlu1 %441 }
 0x288   :  { %750 = vpow2.f32 %v616_v63  ;;  %v615_v1 = vmul.f32 -1.442695, %v314_v0 }
 0x28a   :  { %752 = vpow2.f32 %v615_v1 }
 0x28b   :  { %v440_v30 = vpop.permute.xlu1 %439 }
 0x295   :  { %v751_v2 = vpop.eup %750 }
 0x296   :  { %v323_v3 = vadd.f32 1.0, %v751_v2 }
 0x297   :  { %v753_v5 = vpop.eup %752 }
 0x298   :  { %754 = vrcp.f32 %v323_v3  ;;  %v322_v7 = vadd.f32 1.0, %v753_v5 }
 0x29a   :  { %756 = vrcp.f32 %v322_v7 }
 0x2a5   :  { %v755_v8 = vpop.eup %754 }
 0x2a6   :  { %v331_v10 = vsub.f32 1.0, %v755_v8  ;;  %v329_v14 = vmul.f32 %v755_v8, %v273_v9 }
 0x2a7   :  { %v757_v11 = vpop.eup %756 }
 0x2a8   :  { %v330_v13 = vsub.f32 1.0, %v757_v11  ;;  %v333_v15 = vmul.f32 %v331_v10, %v1015_v6  ;;  %v328_v16 = vmul.f32 %v757_v11, %v272_v12  ;;  %v619_v10 = vld [vmem:[#allocation6 + $0x5] ss:$0 sm:$0xff] }
 0x2a9   :  { %v540_v11 = vmul.f32 %v619_v10, %v999_v4  ;;  %v541_v12 = vmul.f32 %v619_v10, %v1002_v17 }
 0x2aa   :  { %v332_v18 = vmul.f32 %v330_v13, %v1029_v32  ;;  %v335_v19 = vadd.f32 %v333_v15, %v329_v14 }
 0x2ab   :  { %542 = vadd.xlane.f32.xlu0 %v540_v11 }
 0x2ac   :  { %v334_v21 = vadd.f32 %v332_v18, %v328_v16  ;;  %v337_v22 = vadd.f32 %v335_v19, %v1015_v6 }
 0x2ae   :  { %v336_v24 = vadd.f32 %v334_v21, %v1029_v32  ;;  %339 = vst [vmem:[#allocation12 + $0x8] sm:$0xff] %v337_v22 }
 0x2af   :  { %544 = vadd.xlane.f32.xlu0 %v541_v12 }
 0x2b0   :  { %725 = vmatprep.mubr.f32.mxu1 %v336_v24  ;;  %338 = vst [vmem:[#allocation12] sm:$0xff] %v336_v24 }
 0x2b1   :  { %726 = vmatmul.mubr.f32.vlgmr.msra.gmra.mxu1 %v337_v22 }
 0x371   :  { %v727_v27 = vpop.f32.mrf.mxu1 }
 0x372   :  { %v434_v29 = vadd.f32 %v727_v27, %v617_v26 }
 0x373   :  { %v428_v25 = vpop.f32.mrf.mxu1 }
 0x374   :  { %v446_v28 = vadd.f32 %v442_v23, %v434_v29  ;;  %v429_v31 = vadd.f32 %v617_v26, %v428_v25  ;;  %v618_v25 = vld [vmem:[#allocation6 + $0x4] ss:$0 sm:$0xff] }
 0x376   :  { %v454_v33 = vsel %vm209_vm1, %v446_v28, -inf  ;;  %v445_v34 = vadd.f32 %v440_v30, %v429_v31 }
 0x377   :  { %v455_v35 = vrot.slane %v454_v33, 4 }
 0x378   :  { %v447_v6 = vsel %vm209_vm1, %v445_v34, -inf }
 0x379   :  { %v456_v36 = vmax.f32 %v454_v33, %v455_v35  ;;  %v448_v32 = vrot.slane %v447_v6, 4 }
 0x37b   :  { %v457_v37 = vrot.slane %v456_v36, 2  ;;  %v449_v38 = vmax.f32 %v447_v6, %v448_v32 }
 0x37d   :  { %v458_v39 = vmax.f32 %v456_v36, %v457_v37  ;;  %v450_v40 = vrot.slane %v449_v38, 2 }
 0x37f   :  { %v459_v41 = vrot.slane %v458_v39, 1  ;;  %v451_v42 = vmax.f32 %v449_v38, %v450_v40 }
 0x381   :  { %v460_v43 = vmax.f32 %v458_v39, %v459_v41  ;;  %v452_v44 = vrot.slane %v451_v42, 1 }
 0x383   :  { %v462_v45 = vsub.f32 %v446_v28, %v460_v43  ;;  %v453_v46 = vmax.f32 %v451_v42, %v452_v44 }
 0x385   :  { %v465_v47 = vmul.f32 1.442695, %v462_v45  ;;  %v461_v48 = vsub.f32 %v445_v34, %v453_v46 }
 0x387   :  { %758 = vpow2.f32 %v465_v47  ;;  %v463_v49 = vmul.f32 1.442695, %v461_v48 }
 0x389   :  { %760 = vpow2.f32 %v463_v49 }
 0x394   :  { %v759_v50 = vpop.eup %758 }
 0x395   :  { %v474_v51 = vsel %vm209_vm1, %v759_v50, 0.0 }
 0x396   :  { %v761_v54 = vpop.eup %760  ;;  %v475_v55 = vrot.slane %v474_v51, 4 }
 0x397   :  { %v467_v56 = vsel %vm209_vm1, %v761_v54, 0.0 }
 0x398   :  { %v476_v57 = vadd.f32 %v475_v55, %v474_v51  ;;  %v468_v58 = vrot.slane %v467_v56, 4 }
 0x39a   :  { %v469_v59 = vadd.f32 %v468_v58, %v467_v56  ;;  %v477_v60 = vrot.slane %v476_v57, 2 }
 0x39c   :  { %v470_v61 = vrot.slane %v469_v59, 2  ;;  %v478_v62 = vadd.f32 %v477_v60, %v476_v57 }
 0x39e   :  { %v479_v63 = vrot.slane %v478_v62, 1  ;;  %v471_v0 = vadd.f32 %v470_v61, %v469_v59 }
 0x3a0   :  { %v480_v1 = vadd.f32 %v479_v63, %v478_v62  ;;  %v472_v2 = vrot.slane %v471_v0, 1 }
 0x3a2   :  { %762 = vrcp.f32 %v480_v1  ;;  %v473_v3 = vadd.f32 %v472_v2, %v471_v0 }
 0x3a4   :  { %764 = vrcp.f32 %v473_v3 }
 0x3af   :  { %v763_v5 = vpop.eup %762 }
 0x3b0   :  { %v484_v7 = vmul.f32 %v763_v5, %v759_v50 }
 0x3b1   :  { %v765_v8 = vpop.eup %764 }
 0x3b2   :  { %492 = vperm.xlu1 %741, %v484_v7   ;;  %v482_v9 = vmul.f32 %v765_v8, %v761_v54 }
 0x3b6   :  { %487 = vperm.xlu1 %741, %v482_v9  }
 0x42d   :  { %v493_v13 = vpop.permute.xlu1 %492 }
 0x42e   :  { %v496_v14 = vmul.f32 %v493_v13, %v434_v29 }
 0x430   :  { %v503_v15 = vrot.slane %v496_v14, 4 }
 0x431   :  { %v488_v16 = vpop.permute.xlu1 %487 }
 0x432   :  { %v504_v18 = vadd.f32 %v503_v15, %v496_v14  ;;  %v495_v19 = vmul.f32 %v488_v16, %v429_v31 }
 0x434   :  { %v505_v21 = vrot.slane %v504_v18, 2  ;;  %v497_v22 = vrot.slane %v495_v19, 4 }
 0x436   :  { %v506_v24 = vadd.f32 %v505_v21, %v504_v18  ;;  %v498_v23 = vadd.f32 %v497_v22, %v495_v19 }
 0x438   :  { %v507_v26 = vrot.slane %v506_v24, 1  ;;  %v499_v27 = vrot.slane %v498_v23, 2 }
 0x43a   :  { %v508_v30 = vadd.f32 %v507_v26, %v506_v24  ;;  %v500_v28 = vadd.f32 %v499_v27, %v498_v23 }
 0x43c   :  { %v501_v33 = vrot.slane %v500_v28, 1  ;;  %v516_v34 = vmul.f32 %v618_v25, %v508_v30 }
 0x43e   :  { %v502_v35 = vadd.f32 %v501_v33, %v500_v28  ;;  %v519_v36 = vrot.slane %v516_v34, 7 }
 0x440   :  { %v515_v6 = vmul.f32 %v618_v25, %v502_v35 }
 0x442   :  { %v520_v29 = vsel %vm283_vm2, %v519_v36, %v515_v6 }
 0x443   :  { %v522_v32 = vsel %vm286_vm3, %v520_v29, 0.0 }
 0x444   :  { %523 = vadd.xlane.f32.xlu1 %v522_v32 }
 0x445   :  { %877 = shalt.err (!%p874_p1)
}
 0x446   :  { %586 = dma.vmem_to_hbm [thread:$0]  %s581_s16, 256, %s1089_s7, [#allocation4], %s920_s13, %s920_s13, %s921_s14   ;;  %v543_v31 = vpop.xlane.xlu0 %542  ;;  %v509_v20 = vadd.f32 %v502_v35, %v999_v4  ;;  %v510_v55 = vadd.f32 %v508_v30, %v1002_v17 }
 0x447   :  { %s611_s3 = sld [smem:[#allocation11 + $0x1]]  ;;  %s929_s7 = smov [#allocation13]  }
 0x448   :  { %s592_s20 = sshll.u32 %s929_s7, 4  ;;  %s593_s20 = int_to_ptr.vmem [resolvable:$true] %s592_s20 }
 0x449   :  { %s886_s21 = scalar_lea.vmem %s593_s20, 256  ;;  %p891_p3 = scmp.lt.s32.totalorder %s593_s20, %s593_s20 }
 0x44a   :  { %v545_v38 = vpop.xlane.xlu0 %544  ;;  %p887_p2 = scmp.ne.s32.totalorder %s593_s20, %s886_s21  ;;  %p892_p4 = scmp.lt.s32.totalorder %s886_s21, %s886_s21 }
 0x44c   :  { %p893_p5 = por %p892_p4, %p891_p3 }
 0x44d   :  { %v548_v41 = vstv %s611_s3 }
 0x44e   :  { %p894_p6 = pnand %p893_p5, %p887_p2 }
 0x4cd   :  { %v524_v37 = vpop.xlane.xlu1 %523 }
 0x4ce   :  { %v529_v39 = vrot.slane %v524_v37, %v293_v53  ;;  %v533_v40 = vrot.slane %v524_v37, %v297_v52 }
 0x4d0   :  { %v546_v42 = vadd.f32 %v543_v31, %v529_v39  ;;  %v547_v43 = vadd.f32 %v545_v38, %v533_v40 }
 0x4d2   :  { %v549_v44 = vadd.f32 %v548_v41, %v546_v42  ;;  %v550_v45 = vadd.f32 %v548_v41, %v547_v43 }
 0x4d4   :  { %v620_v46 = vmul.f32 -1.442695, %v549_v44  ;;  %v621_v47 = vmul.f32 -1.442695, %v550_v45 }
 0x4d6   :  { %766 = vpow2.f32 %v620_v46 }
 0x4d7   :  { %768 = vpow2.f32 %v621_v47 }
 0x4e3   :  { %v767_v48 = vpop.eup %766 }
 0x4e4   :  { %v769_v49 = vpop.eup %768  ;;  %v557_v50 = vadd.f32 1.0, %v767_v48 }
 0x4e5   :  { %v558_v51 = vadd.f32 1.0, %v769_v49 }
 0x4e6   :  { %770 = vrcp.f32 %v557_v50 }
 0x4e7   :  { %772 = vrcp.f32 %v558_v51 }
 0x4f3   :  { %v771_v54 = vpop.eup %770 }
 0x4f4   :  { %v773_v53 = vpop.eup %772  ;;  %v565_v52 = vsub.f32 1.0, %v771_v54  ;;  %v563_v57 = vmul.f32 %v771_v54, %v509_v20 }
 0x4f5   :  { %v566_v56 = vsub.f32 1.0, %v773_v53  ;;  %v564_v59 = vmul.f32 %v773_v53, %v510_v55 }
 0x4f6   :  { %v567_v58 = vmul.f32 %v565_v52, %v999_v4 }
 0x4f7   :  { %v568_v60 = vmul.f32 %v566_v56, %v1002_v17 }
 0x4f8   :  { %v569_v61 = vadd.f32 %v567_v58, %v563_v57 }
 0x4f9   :  { %v570_v62 = vadd.f32 %v568_v60, %v564_v59 }
 0x4fa   :  { %v571_v63 = vadd.f32 %v569_v61, %v999_v4 }
 0x4fb   :  { %v572_v0 = vadd.f32 %v570_v62, %v1002_v17 }
 0x4fc   :  { %573 = vst [vmem:[#allocation13] sm:$0xff] %v571_v63 }
 0x4fd   :  { %574 = vst [vmem:[#allocation13 + $0x8] sm:$0xff] %v572_v0 }
 0x4fe   :  { %897 = shalt.err (!%p894_p6)
}
 0x4ff   :  { %598 = dma.vmem_to_hbm [thread:$0]  %s593_s20, 256, %s1090_s8, [#allocation14], %s920_s13, %s920_s13, %s921_s14  }
 0x500   :  { %914 = dma.done.wait [#allocation4], 256  }
 0x501   :  { %915 = vsyncadd [#allocation4], 4294967040 }
 0x502   :  { %916 = dma.done.wait [#allocation14], 256  }
 0x503   :  { %917 = vsyncadd [#allocation14], 4294967040 }
 0x504   :  { %605 = vsyncpa [#allocation3], 1 }
 0x505   :  { %606 = vsyncpa [#allocation7], 1 }
 0x506   :  { %607 = vsyncpa [#allocation10], 1 }
 0x507   :  { %608 = vsyncpa [#allocation4], 1 }
 0x508   :  { %609 = vsyncpa [#allocation14], 1 }
 0x509   :  { %610 = vsyncpa [#allocation5], 1 }

</bundles_post_ra>
